<compile_context>
chip_gen: v5e
topology: v5e:2x2
jax: 0.10.0
libtpu: 0.0.40
codegen_flags: <defaults>
</compile_context>

<pallas_src>
import jax
import jax.numpy as jnp
from jax import lax
from jax.experimental import pallas as pl
from jax.experimental.pallas import tpu as pltpu

EPS = 1e-5  # nn.BatchNorm1d default eps


# ---------------------------------------------------------------------------
# In-kernel helpers: zero-padded shifts along the lane (length) axis.
# (Concatenate-with-zeros is used instead of pltpu.roll+mask: it is a proven
#  lowering here and, after the output-side-shift restructuring, only touches
#  small (C, L)-sized slices.)
# ---------------------------------------------------------------------------
def _shift_minus(v):
    """returns y with y[:, t] = v[:, t-1] and y[:, 0] = 0."""
    return jnp.concatenate([jnp.zeros_like(v[:, :1]), v[:, :-1]], axis=1)


def _shift_plus(v):
    """returns y with y[:, t] = v[:, t+1] and y[:, L-1] = 0."""
    return jnp.concatenate([v[:, 1:], jnp.zeros_like(v[:, :1])], axis=1)


# ---------------------------------------------------------------------------
# Pallas kernels
# ---------------------------------------------------------------------------
def conv1_stats_kernel(x_ref, w_ref, z1_ref, stats_ref):
    """layer1: Conv1d(C -> 2C, k=3, pad=1) as ONE MXU dot with the 3 taps
    stacked along the contraction dim, plus per-batch partial BN1 statistics
    (sum, sum of squares) per channel (f32)."""
    x = x_ref[0]                                           # (C, L) f32, lanes = L
    x3 = jnp.concatenate([_shift_minus(x), x, _shift_plus(x)], axis=0)   # (3C, L)
    z = jnp.dot(w_ref[...], x3.astype(jnp.bfloat16),
                preferred_element_type=jnp.float32)        # (2C, L) f32 accum
    z1_ref[0] = z.astype(jnp.bfloat16)                     # bf16 inter-pass tensor
    stats_ref[0] = jnp.concatenate(
        [jnp.sum(z, axis=1, keepdims=True),
         jnp.sum(z * z, axis=1, keepdims=True)], axis=1)   # (2C, 2) f32


def bn1_conv2_stats_kernel(z1_ref, scale1_ref, shift1_ref, w_ref,
                           z2e_ref, z2o_ref, stats_ref):
    """bn1 (folded scale/shift, f32) + ReLU + (virtual) JustExpand + layer2 conv
    as ONE MXU dot, plus per-batch partial BN2 statistics.

    The expand permutation is never materialized: conv2 outputs at even (2t)
    and odd (2t+1) positions come from row slices of a single merged matmul
    against the un-expanded layer-1 activation y (2C, L); the +/-1 taps are
    applied as lane shifts of the (C, L) result slices."""
    y = jnp.maximum(z1_ref[0].astype(jnp.float32) * scale1_ref[...]
                    + shift1_ref[...], 0.0)                # (2C, L) f32
    r = jnp.dot(w_ref[...], y.astype(jnp.bfloat16),
                preferred_element_type=jnp.float32)        # (4C, L) f32 accum
    c = r.shape[0] // 4
    z2e = r[:c] + _shift_minus(r[c:2 * c])                 # (C, L) even phase
    z2o = r[2 * c:3 * c] + _shift_plus(r[3 * c:])          # (C, L) odd phase
    z2e_ref[0] = z2e.astype(jnp.bfloat16)
    z2o_ref[0] = z2o.astype(jnp.bfloat16)
    stats_ref[0] = jnp.concatenate(
        [jnp.sum(z2e, axis=1, keepdims=True) + jnp.sum(z2o, axis=1, keepdims=True),
         jnp.sum(z2e * z2e, axis=1, keepdims=True)
         + jnp.sum(z2o * z2o, axis=1, keepdims=True)], axis=1)           # (C, 2)


# ---------------------------------------------------------------------------
# Wrapper-side tiny preprocessing (per-channel / weight-sized arrays only)
# ---------------------------------------------------------------------------
def _bn_scale_shift(sum_, sumsq, count, gamma, beta):
    """Fold training-mode BatchNorm into one per-channel scale/shift.
    (Single-pass var = E[z^2] - mean^2, clamped at 0; adequate in f32 for the
     activation magnitudes here -- see review note on compensated sums.)"""
    mean = sum_ / count
    var = jnp.maximum(sumsq / count - mean * mean, 0.0)
    scale = gamma * lax.rsqrt(var + EPS)
    shift = beta - mean * scale
    return scale[:, None], shift[:, None]


def _split_conv2_weights(W2):
    """W2 (Cout, Cin, 3) -> four (Cout, 2*Cin) matrices acting on the
    un-expanded layer-1 activation y (rows ordered 2c+j):
      z2[:, 2t]   = A_even @ y[:, t] + B_even @ y[:, t-1]
      z2[:, 2t+1] = A_odd  @ y[:, t] + B_odd  @ y[:, t+1]
    """
    Cout, Cin, K = W2.shape
    assert K == 3
    zeros = jnp.zeros((Cout, Cin), W2.dtype)

    def interleave_cols(a, b):   # out[:, 2c] = a[:, c]; out[:, 2c+1] = b[:, c]
        return jnp.stack([a, b], axis=-1).reshape(Cout, 2 * Cin)

    a_even = interleave_cols(W2[:, :, 1], W2[:, :, 2])
    b_even = interleave_cols(zeros, W2[:, :, 0])          # applied to y[:, t-1]
    a_odd = interleave_cols(W2[:, :, 0], W2[:, :, 1])
    b_odd = interleave_cols(W2[:, :, 2], zeros)           # applied to y[:, t+1]
    return a_even, b_even, a_odd, b_odd


def expand_residual_forward(x_ncl, params):
    """x_ncl: (B, C, L) float32 (PyTorch NCL). Returns (B, C, 2*L) float32."""
    W1, b1, g1, be1, W2, b2, g2, be2 = params
    del b1, b2   # per-channel conv bias before training-mode BatchNorm is a no-op
    B, C, L = x_ncl.shape
    C2, C3, C4 = 2 * C, 3 * C, 4 * C
    f32, bf16 = jnp.float32, jnp.bfloat16
    cparams = pltpu.CompilerParams(
        dimension_semantics=("parallel",),
        vmem_limit_bytes=64 * 1024 * 1024,
    )

    # Tiny weight preprocessing (weight-sized arrays, negligible cost).
    w1_flat = jnp.concatenate(
        [W1[:, :, 0], W1[:, :, 1], W1[:, :, 2]], axis=1).astype(bf16)   # (2C, 3C)
    a_ev, b_ev, a_od, b_od = _split_conv2_weights(W2.astype(f32))
    w2_flat = jnp.concatenate([a_ev, b_ev, a_od, b_od], axis=0).astype(bf16)  # (4C, 2C)

    x_f32 = x_ncl.astype(f32)

    # ---- pass 1: conv1 (single dot) + partial BN1 stats, one batch elem/step --
    z1, stats1 = pl.pallas_call(
        conv1_stats_kernel,
        grid=(B,),
        in_specs=[
            pl.BlockSpec((1, C, L), lambda b: (b, 0, 0)),
            pl.BlockSpec((C2, C3), lambda b: (0, 0)),
        ],
        out_specs=(
            pl.BlockSpec((1, C2, L), lambda b: (b, 0, 0)),
            pl.BlockSpec((1, C2, 2), lambda b: (b, 0, 0)),
        ),
        out_shape=(
            jax.ShapeDtypeStruct((B, C2, L), bf16),
            jax.ShapeDtypeStruct((B, C2, 2), f32),
        ),
        compiler_params=cparams,
    )(x_f32, w1_flat)

    scale1, shift1 = _bn_scale_shift(
        jnp.sum(stats1[:, :, 0], axis=0), jnp.sum(stats1[:, :, 1], axis=0),
        B * L, g1.astype(f32), be1.astype(f32))            # (2C, 1) each

    # ---- pass 2: bn1 + relu + (virtual) expand + conv2 (single dot) + stats ---
    z2e, z2o, stats2 = pl.pallas_call(
        bn1_conv2_stats_kernel,
        grid=(B,),
        in_specs=[
            pl.BlockSpec((1, C2, L), lambda b: (b, 0, 0)),
            pl.BlockSpec((C2, 1), lambda b: (0, 0)),
            pl.BlockSpec((C2, 1), lambda b: (0, 0)),
            pl.BlockSpec((C4, C2), lambda b: (0, 0)),
        ],
        out_specs=(
            pl.BlockSpec((1, C, L), lambda b: (b, 0, 0)),
            pl.BlockSpec((1, C, L), lambda b: (b, 0, 0)),
            pl.BlockSpec((1, C, 2), lambda b: (b, 0, 0)),
        ),
        out_shape=(
            jax.ShapeDtypeStruct((B, C, L), bf16),
            jax.ShapeDtypeStruct((B, C, L), bf16),
            jax.ShapeDtypeStruct((B, C, 2), f32),
        ),
        compiler_params=cparams,
    )(z1, scale1, shift1, w2_flat)

    scale2, shift2 = _bn_scale_shift(
        jnp.sum(stats2[:, :, 0], axis=0), jnp.sum(stats2[:, :, 1], axis=0),
        B * 2 * L, g2.astype(f32), be2.astype(f32))        # (C, 1) each

    # ---- fused XLA epilogue: bn2-apply + residual gather + relu + interleave --
    # This compiles to a single elementwise output fusion: read z2e/z2o (bf16),
    # read x, write the final (B, C, 2L) once.  Equal HBM traffic to a fused
    # Pallas pass 3 and no Mosaic lane-interleave / lane-strided-store risk.
    idx_e = (2 * jnp.arange(C)) % C                        # residual channel map, even
    idx_o = (2 * jnp.arange(C) + 1) % C                    # residual channel map, odd
    s2 = scale2.reshape(1, C, 1)
    h2 = shift2.reshape(1, C, 1)
    out_e = z2e.astype(f32) * s2 + h2 + jnp.take(x_f32, idx_e, axis=1)
    out_o = z2o.astype(f32) * s2 + h2 + jnp.take(x_f32, idx_o, axis=1)
    out = jnp.maximum(jnp.stack([out_e, out_o], axis=-1), 0.0).reshape(B, C, 2 * L)
    return out


# ---------------------------------------------------------------------------
# Pure-JAX reference (mirrors the PyTorch forward, for a correctness check)
# ---------------------------------------------------------------------------
def reference(x_ncl, params):
    W1, b1, g1, be1, W2, b2, g2, be2 = params
    B, C, L = x_ncl.shape
    pad = (W1.shape[-1] - 1) // 2

    def conv1d(x, W, b):
        y = lax.conv_general_dilated(
            x, W, window_strides=(1,), padding=[(pad, pad)],
            dimension_numbers=('NCH', 'OIH', 'NCH'))
        return y + b[None, :, None]

    def bn(x, g, be):
        m = jnp.mean(x, axis=(0, 2), keepdims=True)
        v = jnp.mean((x - m) ** 2, axis=(0, 2), keepdims=True)
        return (x - m) * lax.rsqrt(v + EPS) * g[None, :, None] + be[None, :, None]

    def expand(x, out_c):
        b_, _, l_ = x.shape
        return jnp.swapaxes(x.reshape(b_, out_c, 2, l_), 2, 3).reshape(b_, out_c, 2 * l_)

    out = conv1d(x_ncl, W1, b1)
    out = bn(out, g1, be1)
    out = expand(out, C)
    res = expand(jnp.concatenate([x_ncl, x_ncl], axis=1), C)
    out = jnp.maximum(out, 0.0)
    out = conv1d(out, W2, b2)
    out = bn(out, g2, be2)
    out = out + res
    return jnp.maximum(out, 0.0)


# ---------------------------------------------------------------------------
if __name__ == "__main__":
    B, C, L, K = 2, 4, 16, 3
    key = jax.random.PRNGKey(0)
    ks = jax.random.split(key, 9)

    x = jax.random.normal(ks[0], (B, C, L), jnp.float32)

    # Deterministic synthetic parameters (Conv1d weight layout: (Cout, Cin, K)).
    W1 = 0.3 * jax.random.normal(ks[1], (2 * C, C, K), jnp.float32)
    b1 = 0.1 * jax.random.normal(ks[2], (2 * C,), jnp.float32)
    g1 = 1.0 + 0.1 * jax.random.normal(ks[3], (2 * C,), jnp.float32)
    be1 = 0.1 * jax.random.normal(ks[4], (2 * C,), jnp.float32)
    W2 = 0.3 * jax.random.normal(ks[5], (C, C, K), jnp.float32)
    b2 = 0.1 * jax.random.normal(ks[6], (C,), jnp.float32)
    g2 = 1.0 + 0.1 * jax.random.normal(ks[7], (C,), jnp.float32)
    be2 = 0.1 * jax.random.normal(ks[8], (C,), jnp.float32)
    params = (W1, b1, g1, be1, W2, b2, g2, be2)

    fwd = jax.jit(expand_residual_forward)
    out = jax.block_until_ready(fwd(x, params))
    assert out.shape == (B, C, 2 * L), out.shape

    ref = reference(x, params)
    # Tolerance sized for bf16 MXU inputs and bf16 inter-pass tensors vs. the
    # all-f32 reference.
    if not jnp.allclose(out, ref, atol=6e-2, rtol=6e-2):
        err = float(jnp.max(jnp.abs(out - ref)))
        raise AssertionError(f"Pallas output does not match reference (max err {err})")
    print("KERNEL_OK")
</pallas_src>

<mosaic_0001>
module attributes {stable_mosaic.version = 11 : i64} {
  func.func @bn1_conv2_stats_kernel(%arg0: i32, %arg1: memref<1x8x16xbf16, #tpu.memory_space<vmem>>, %arg2: memref<8x1xf32, #tpu.memory_space<vmem>>, %arg3: memref<8x1xf32, #tpu.memory_space<vmem>>, %arg4: memref<16x8xbf16, #tpu.memory_space<vmem>>, %arg5: memref<1x4x16xbf16, #tpu.memory_space<vmem>>, %arg6: memref<1x4x16xbf16, #tpu.memory_space<vmem>>, %arg7: memref<1x4x2xf32, #tpu.memory_space<vmem>>) attributes {dimension_semantics = [#tpu.dimension_semantics<parallel>], iteration_bounds = array<i64: 2>, scalar_prefetch = 0 : i64, scratch_operands = 0 : i64, tpu.core_type = #tpu.core_type<tc>, window_params = [{transform_indices = @transform_0, window_bounds = array<i64: 1, 8, 16>}, {pipeline_mode = #tpu.pipeline_mode<synchronous>, transform_indices = @transform_1, window_bounds = array<i64: 8, 1>}, {pipeline_mode = #tpu.pipeline_mode<synchronous>, transform_indices = @transform_2, window_bounds = array<i64: 8, 1>}, {pipeline_mode = #tpu.pipeline_mode<synchronous>, transform_indices = @transform_3, window_bounds = array<i64: 16, 8>}, {transform_indices = @transform_4, window_bounds = array<i64: 1, 4, 16>}, {transform_indices = @transform_5, window_bounds = array<i64: 1, 4, 16>}, {transform_indices = @transform_6, window_bounds = array<i64: 1, 4, 2>}]} {
    %c0 = arith.constant 0 : index
    %c0_0 = arith.constant 0 : index
    %c0_1 = arith.constant 0 : index
    %0 = vector.load %arg1[%c0, %c0_0, %c0_1] : memref<1x8x16xbf16, #tpu.memory_space<vmem>>, vector<1x8x16xbf16>
    %1 = vector.shape_cast %0 : vector<1x8x16xbf16> to vector<8x16xbf16>
    %2 = arith.extf %1 : vector<8x16xbf16> to vector<8x16xf32>
    %c0_2 = arith.constant 0 : index
    %c0_3 = arith.constant 0 : index
    %3 = vector.load %arg2[%c0_2, %c0_3] : memref<8x1xf32, #tpu.memory_space<vmem>>, vector<8x1xf32>
    %4 = vector.broadcast %3 : vector<8x1xf32> to vector<8x16xf32>
    %5 = arith.mulf %2, %4 : vector<8x16xf32>
    %c0_4 = arith.constant 0 : index
    %c0_5 = arith.constant 0 : index
    %6 = vector.load %arg3[%c0_4, %c0_5] : memref<8x1xf32, #tpu.memory_space<vmem>>, vector<8x1xf32>
    %7 = vector.broadcast %6 : vector<8x1xf32> to vector<8x16xf32>
    %8 = arith.addf %5, %7 : vector<8x16xf32>
    %cst = arith.constant 0.000000e+00 : f32
    %9 = vector.broadcast %cst : f32 to vector<8x16xf32>
    %10 = arith.maximumf %8, %9 : vector<8x16xf32>
    %c0_6 = arith.constant 0 : index
    %c0_7 = arith.constant 0 : index
    %11 = vector.load %arg4[%c0_6, %c0_7] : memref<16x8xbf16, #tpu.memory_space<vmem>>, vector<16x8xbf16>
    %12 = arith.truncf %10 : vector<8x16xf32> to vector<8x16xbf16>
    %cst_8 = arith.constant dense<0.000000e+00> : vector<16x16xf32>
    %13 = tpu.matmul %11, %12, %cst_8 {dimension_numbers = #tpu.dot_dimension_numbers<[1], [0], [0], [1], [0, 0, 1, 1], [], []>} : vector<16x8xbf16>, vector<8x16xbf16>, vector<16x16xf32> -> vector<16x16xf32>
    %14 = vector.extract_strided_slice %13 {offsets = [0, 0], sizes = [4, 16], strides = [1, 1]} : vector<16x16xf32> to vector<4x16xf32>
    %15 = vector.extract_strided_slice %13 {offsets = [4, 0], sizes = [4, 16], strides = [1, 1]} : vector<16x16xf32> to vector<4x16xf32>
    %cst_9 = arith.constant 0.000000e+00 : f32
    %16 = vector.broadcast %cst_9 : f32 to vector<4x1xf32>
    %17 = vector.extract_strided_slice %15 {offsets = [0, 0], sizes = [4, 15], strides = [1, 1]} : vector<4x16xf32> to vector<4x15xf32>
    %18 = tpu.concatenate %16, %17 in 1 : vector<4x1xf32>, vector<4x15xf32> -> vector<4x16xf32>
    %19 = arith.addf %14, %18 : vector<4x16xf32>
    %20 = vector.extract_strided_slice %13 {offsets = [8, 0], sizes = [4, 16], strides = [1, 1]} : vector<16x16xf32> to vector<4x16xf32>
    %21 = vector.extract_strided_slice %13 {offsets = [12, 0], sizes = [4, 16], strides = [1, 1]} : vector<16x16xf32> to vector<4x16xf32>
    %22 = vector.extract_strided_slice %21 {offsets = [0, 1], sizes = [4, 15], strides = [1, 1]} : vector<4x16xf32> to vector<4x15xf32>
    %cst_10 = arith.constant 0.000000e+00 : f32
    %23 = vector.broadcast %cst_10 : f32 to vector<4x1xf32>
    %24 = tpu.concatenate %22, %23 in 1 : vector<4x15xf32>, vector<4x1xf32> -> vector<4x16xf32>
    %25 = arith.addf %20, %24 : vector<4x16xf32>
    %26 = arith.truncf %19 : vector<4x16xf32> to vector<4x16xbf16>
    %c0_11 = arith.constant 0 : index
    %c0_12 = arith.constant 0 : index
    %c0_13 = arith.constant 0 : index
    %27 = vector.load %arg5[%c0_11, %c0_12, %c0_13] : memref<1x4x16xbf16, #tpu.memory_space<vmem>>, vector<1x4x16xbf16>
    %28 = vector.shape_cast %27 : vector<1x4x16xbf16> to vector<4x16xbf16>
    %29 = vector.shape_cast %26 : vector<4x16xbf16> to vector<1x4x16xbf16>
    tpu.vector_store %arg5[%c0_11, %c0_12, %c0_13], %29 {strides = array<i32>} : memref<1x4x16xbf16, #tpu.memory_space<vmem>>, vector<1x4x16xbf16>,
    %30 = arith.truncf %25 : vector<4x16xf32> to vector<4x16xbf16>
    %c0_14 = arith.constant 0 : index
    %c0_15 = arith.constant 0 : index
    %c0_16 = arith.constant 0 : index
    %31 = vector.load %arg6[%c0_14, %c0_15, %c0_16] : memref<1x4x16xbf16, #tpu.memory_space<vmem>>, vector<1x4x16xbf16>
    %32 = vector.shape_cast %31 : vector<1x4x16xbf16> to vector<4x16xbf16>
    %33 = vector.shape_cast %30 : vector<4x16xbf16> to vector<1x4x16xbf16>
    tpu.vector_store %arg6[%c0_14, %c0_15, %c0_16], %33 {strides = array<i32>} : memref<1x4x16xbf16, #tpu.memory_space<vmem>>, vector<1x4x16xbf16>,
    %cst_17 = arith.constant dense<0.000000e+00> : vector<4xf32>
    %34 = vector.multi_reduction <add>, %19, %cst_17 [1] : vector<4x16xf32> to vector<4xf32>
    %35 = vector.shape_cast %34 : vector<4xf32> to vector<4x1xf32>
    %cst_18 = arith.constant dense<0.000000e+00> : vector<4xf32>
    %36 = vector.multi_reduction <add>, %25, %cst_18 [1] : vector<4x16xf32> to vector<4xf32>
    %37 = vector.shape_cast %36 : vector<4xf32> to vector<4x1xf32>
    %38 = arith.addf %35, %37 : vector<4x1xf32>
    %39 = arith.mulf %19, %19 : vector<4x16xf32>
    %cst_19 = arith.constant dense<0.000000e+00> : vector<4xf32>
    %40 = vector.multi_reduction <add>, %39, %cst_19 [1] : vector<4x16xf32> to vector<4xf32>
    %41 = vector.shape_cast %40 : vector<4xf32> to vector<4x1xf32>
    %42 = arith.mulf %25, %25 : vector<4x16xf32>
    %cst_20 = arith.constant dense<0.000000e+00> : vector<4xf32>
    %43 = vector.multi_reduction <add>, %42, %cst_20 [1] : vector<4x16xf32> to vector<4xf32>
    %44 = vector.shape_cast %43 : vector<4xf32> to vector<4x1xf32>
    %45 = arith.addf %41, %44 : vector<4x1xf32>
    %46 = tpu.concatenate %38, %45 in 1 : vector<4x1xf32>, vector<4x1xf32> -> vector<4x2xf32>
    %c0_21 = arith.constant 0 : index
    %c0_22 = arith.constant 0 : index
    %c0_23 = arith.constant 0 : index
    %47 = vector.load %arg7[%c0_21, %c0_22, %c0_23] : memref<1x4x2xf32, #tpu.memory_space<vmem>>, vector<1x4x2xf32>
    %48 = vector.shape_cast %47 : vector<1x4x2xf32> to vector<4x2xf32>
    %49 = vector.shape_cast %46 : vector<4x2xf32> to vector<1x4x2xf32>
    tpu.vector_store %arg7[%c0_21, %c0_22, %c0_23], %49 {strides = array<i32>} : memref<1x4x2xf32, #tpu.memory_space<vmem>>, vector<1x4x2xf32>,
    return
  }
  func.func @transform_0(%arg0: i32) -> (i32, i32, i32) {
    %c0_i32 = arith.constant 0 : i32
    %c0_i32_0 = arith.constant 0 : i32
    %c0_i32_1 = arith.constant 0 : i32
    return %arg0, %c0_i32, %c0_i32_0 : i32, i32, i32
  }
  func.func @transform_1(%arg0: i32) -> (i32, i32) {
    %c0_i32 = arith.constant 0 : i32
    %c0_i32_0 = arith.constant 0 : i32
    %c0_i32_1 = arith.constant 0 : i32
    return %c0_i32, %c0_i32_0 : i32, i32
  }
  func.func @transform_2(%arg0: i32) -> (i32, i32) {
    %c0_i32 = arith.constant 0 : i32
    %c0_i32_0 = arith.constant 0 : i32
    %c0_i32_1 = arith.constant 0 : i32
    return %c0_i32, %c0_i32_0 : i32, i32
  }
  func.func @transform_3(%arg0: i32) -> (i32, i32) {
    %c0_i32 = arith.constant 0 : i32
    %c0_i32_0 = arith.constant 0 : i32
    %c0_i32_1 = arith.constant 0 : i32
    return %c0_i32, %c0_i32_0 : i32, i32
  }
  func.func @transform_4(%arg0: i32) -> (i32, i32, i32) {
    %c0_i32 = arith.constant 0 : i32
    %c0_i32_0 = arith.constant 0 : i32
    %c0_i32_1 = arith.constant 0 : i32
    return %arg0, %c0_i32, %c0_i32_0 : i32, i32, i32
  }
  func.func @transform_5(%arg0: i32) -> (i32, i32, i32) {
    %c0_i32 = arith.constant 0 : i32
    %c0_i32_0 = arith.constant 0 : i32
    %c0_i32_1 = arith.constant 0 : i32
    return %arg0, %c0_i32, %c0_i32_0 : i32, i32, i32
  }
  func.func @transform_6(%arg0: i32) -> (i32, i32, i32) {
    %c0_i32 = arith.constant 0 : i32
    %c0_i32_0 = arith.constant 0 : i32
    %c0_i32_1 = arith.constant 0 : i32
    return %arg0, %c0_i32, %c0_i32_0 : i32, i32, i32
  }
}

module attributes {stable_mosaic.version = 11 : i64} {
  func.func @conv1_stats_kernel(%arg0: i32, %arg1: memref<1x4x16xf32, #tpu.memory_space<vmem>>, %arg2: memref<8x12xbf16, #tpu.memory_space<vmem>>, %arg3: memref<1x8x16xbf16, #tpu.memory_space<vmem>>, %arg4: memref<1x8x2xf32, #tpu.memory_space<vmem>>) attributes {dimension_semantics = [#tpu.dimension_semantics<parallel>], iteration_bounds = array<i64: 2>, scalar_prefetch = 0 : i64, scratch_operands = 0 : i64, tpu.core_type = #tpu.core_type<tc>, window_params = [{transform_indices = @transform_0, window_bounds = array<i64: 1, 4, 16>}, {pipeline_mode = #tpu.pipeline_mode<synchronous>, transform_indices = @transform_1, window_bounds = array<i64: 8, 12>}, {transform_indices = @transform_2, window_bounds = array<i64: 1, 8, 16>}, {transform_indices = @transform_3, window_bounds = array<i64: 1, 8, 2>}]} {
    %c0 = arith.constant 0 : index
    %c0_0 = arith.constant 0 : index
    %c0_1 = arith.constant 0 : index
    %0 = vector.load %arg1[%c0, %c0_0, %c0_1] : memref<1x4x16xf32, #tpu.memory_space<vmem>>, vector<1x4x16xf32>
    %1 = vector.shape_cast %0 : vector<1x4x16xf32> to vector<4x16xf32>
    %cst = arith.constant 0.000000e+00 : f32
    %2 = vector.broadcast %cst : f32 to vector<4x1xf32>
    %3 = vector.extract_strided_slice %1 {offsets = [0, 0], sizes = [4, 15], strides = [1, 1]} : vector<4x16xf32> to vector<4x15xf32>
    %4 = tpu.concatenate %2, %3 in 1 : vector<4x1xf32>, vector<4x15xf32> -> vector<4x16xf32>
    %5 = vector.extract_strided_slice %1 {offsets = [0, 1], sizes = [4, 15], strides = [1, 1]} : vector<4x16xf32> to vector<4x15xf32>
    %cst_2 = arith.constant 0.000000e+00 : f32
    %6 = vector.broadcast %cst_2 : f32 to vector<4x1xf32>
    %7 = tpu.concatenate %5, %6 in 1 : vector<4x15xf32>, vector<4x1xf32> -> vector<4x16xf32>
    %8 = tpu.concatenate %4, %1, %7 in 0 : vector<4x16xf32>, vector<4x16xf32>, vector<4x16xf32> -> vector<12x16xf32>
    %c0_3 = arith.constant 0 : index
    %c0_4 = arith.constant 0 : index
    %9 = vector.load %arg2[%c0_3, %c0_4] : memref<8x12xbf16, #tpu.memory_space<vmem>>, vector<8x12xbf16>
    %10 = arith.truncf %8 : vector<12x16xf32> to vector<12x16xbf16>
    %cst_5 = arith.constant dense<0.000000e+00> : vector<8x16xf32>
    %11 = tpu.matmul %9, %10, %cst_5 {dimension_numbers = #tpu.dot_dimension_numbers<[1], [0], [0], [1], [0, 0, 1, 1], [], []>} : vector<8x12xbf16>, vector<12x16xbf16>, vector<8x16xf32> -> vector<8x16xf32>
    %12 = arith.truncf %11 : vector<8x16xf32> to vector<8x16xbf16>
    %c0_6 = arith.constant 0 : index
    %c0_7 = arith.constant 0 : index
    %c0_8 = arith.constant 0 : index
    %13 = vector.load %arg3[%c0_6, %c0_7, %c0_8] : memref<1x8x16xbf16, #tpu.memory_space<vmem>>, vector<1x8x16xbf16>
    %14 = vector.shape_cast %13 : vector<1x8x16xbf16> to vector<8x16xbf16>
    %15 = vector.shape_cast %12 : vector<8x16xbf16> to vector<1x8x16xbf16>
    tpu.vector_store %arg3[%c0_6, %c0_7, %c0_8], %15 {strides = array<i32>} : memref<1x8x16xbf16, #tpu.memory_space<vmem>>, vector<1x8x16xbf16>,
    %cst_9 = arith.constant dense<0.000000e+00> : vector<8xf32>
    %16 = vector.multi_reduction <add>, %11, %cst_9 [1] : vector<8x16xf32> to vector<8xf32>
    %17 = vector.shape_cast %16 : vector<8xf32> to vector<8x1xf32>
    %18 = arith.mulf %11, %11 : vector<8x16xf32>
    %cst_10 = arith.constant dense<0.000000e+00> : vector<8xf32>
    %19 = vector.multi_reduction <add>, %18, %cst_10 [1] : vector<8x16xf32> to vector<8xf32>
    %20 = vector.shape_cast %19 : vector<8xf32> to vector<8x1xf32>
    %21 = tpu.concatenate %17, %20 in 1 : vector<8x1xf32>, vector<8x1xf32> -> vector<8x2xf32>
    %c0_11 = arith.constant 0 : index
    %c0_12 = arith.constant 0 : index
    %c0_13 = arith.constant 0 : index
    %22 = vector.load %arg4[%c0_11, %c0_12, %c0_13] : memref<1x8x2xf32, #tpu.memory_space<vmem>>, vector<1x8x2xf32>
    %23 = vector.shape_cast %22 : vector<1x8x2xf32> to vector<8x2xf32>
    %24 = vector.shape_cast %21 : vector<8x2xf32> to vector<1x8x2xf32>
    tpu.vector_store %arg4[%c0_11, %c0_12, %c0_13], %24 {strides = array<i32>} : memref<1x8x2xf32, #tpu.memory_space<vmem>>, vector<1x8x2xf32>,
    return
  }
  func.func @transform_0(%arg0: i32) -> (i32, i32, i32) {
    %c0_i32 = arith.constant 0 : i32
    %c0_i32_0 = arith.constant 0 : i32
    %c0_i32_1 = arith.constant 0 : i32
    return %arg0, %c0_i32, %c0_i32_0 : i32, i32, i32
  }
  func.func @transform_1(%arg0: i32) -> (i32, i32) {
    %c0_i32 = arith.constant 0 : i32
    %c0_i32_0 = arith.constant 0 : i32
    %c0_i32_1 = arith.constant 0 : i32
    return %c0_i32, %c0_i32_0 : i32, i32
  }
  func.func @transform_2(%arg0: i32) -> (i32, i32, i32) {
    %c0_i32 = arith.constant 0 : i32
    %c0_i32_0 = arith.constant 0 : i32
    %c0_i32_1 = arith.constant 0 : i32
    return %arg0, %c0_i32, %c0_i32_0 : i32, i32, i32
  }
  func.func @transform_3(%arg0: i32) -> (i32, i32, i32) {
    %c0_i32 = arith.constant 0 : i32
    %c0_i32_0 = arith.constant 0 : i32
    %c0_i32_1 = arith.constant 0 : i32
    return %arg0, %c0_i32, %c0_i32_0 : i32, i32, i32
  }
}

</mosaic_0001>

<bundles_post_ra>
// kernel: expand_residual_forward.3
= control target key start
LH: loop header
LB: loop body
LE: loop exit
PB: predicated region body
PF: predicated region fallthrough
CT: control target
= control target key end

     0   :  { %s549_s21 = smov 0   ;;  %s593_s0 = inlined_call_operand.vmem [shape: bf16[2,8,16], index: 0, kind: input, shape index: {}]   ;;  %s594_s1 = inlined_call_operand.vmem [shape: f32[8,1], index: 1, kind: input, shape index: {}]   ;;  %s595_s2 = inlined_call_operand.vmem [shape: f32[8,1], index: 2, kind: input, shape index: {}]   ;;  %s596_s3 = inlined_call_operand.vmem [shape: bf16[16,8], index: 3, kind: input, shape index: {}]   ;;  %s597_s4 = inlined_call_operand.vmem [shape: bf16[2,4,16], index: 4, kind: output, shape index: {0}]   ;;  %s598_s5 = inlined_call_operand.vmem [shape: bf16[2,4,16], index: 5, kind: output, shape index: {1}]   ;;  %s599_s6 = inlined_call_operand.vmem [shape: f32[2,4,2], index: 6, kind: output, shape index: {2}]  }
   0x1 LB: > { %s474_s22 = sadd.s32 4294967295, %s509_s21   ;;  %p478_p0 = scmp.ge.s32.totalorder %s509_s21, 1  ;;  %s509_s21 = sphi %s549_s21, %s17_s21  }
   0x2   : > { %p216_p1 = scmp.lt.s32.totalorder %s509_s21, 3 }
   0x4   : > { %p217_p2 = pnand %p478_p0, %p216_p1 }
   0x5   : > { %p252_p3 = scmp.lt.s32.totalorder (!%p217_p2), %s474_s22, 1  ;;  %s512_s9 = smov (!%p217_p2), 127  }
   0x6   : > { %220 = sbr.rel (%p217_p2) target bundleno = 535 (0x217), region = 36  ;;  %s513_s10 = smov (!%p217_p2), 1  }
   0xb   : > { %v271_v0 = vld [vmem:[%s594_s1] sm:$0xff]  ;;  %v511_v1 = vmov 0   ;;  %s601_s22 = smov (!%p252_p3, %s474_s22), 1  ;;  %vm298_vm0 = vcmask 1043456   ;;  %vm294_vm1 = vcmask 64512   ;;  %vm328_vm2 = vcmask 121856  }
   0xc   : > { %502 = vset.pattern.permute.xlu0 %v511_v1  ;;  %v278_v2 = vld [vmem:[%s595_s2] sm:$0xff]  ;;  %s479_s27 = sshll.u32 %s601_s22, 2  ;;  %s480_s11 = sshll.u32 %s601_s22, 1  ;;  %vm335_vm3 = vcmask 123904   ;;  %vm321_vm4 = vcmask 7168   ;;  %vm339_vm5 = vcmask 125952  }
   0xd   : > { %274 = vperm.xlu0 %502, %v271_v0   ;;  %s255_s30 = scalar_lea.vmem %s593_s0, %s479_s27  ;;  %v490_v12 = vld [vmem:[%s596_s3] sm:$0xff]  ;;  %s263_s14 = scalar_lea.vmem %s598_s5, %s480_s11  ;;  %vm357_vm6 = vcmask 11264  }
   0xe   : > { %v269_v4 = vld [vmem:[%s255_s30] sm:$0xf]  ;;  %s259_s17 = scalar_lea.vmem %s597_s4, %s480_s11  ;;  %s267_s20 = scalar_lea.vmem %s599_s6, %s479_s27 }
   0xf   : > { %v270_v5 = vunpack.c.l.bf16 %v269_v4 }
  0x15   : > { %281 = vperm.xlu0 %502, %v278_v2  }
  0x7f   : > { %v275_v3 = vpop.permute.xlu0 %274 }
  0x80   : > { %v277_v6 = vmul.f32 %v275_v3, %v270_v5 }
  0x87   : > { %v282_v7 = vpop.permute.xlu0 %281 }
  0x88   : > { %v284_v8 = vadd.f32 %v282_v7, %v277_v6 }
  0x8a   : > { %v285_v9 = vmax.f32 %v284_v8, 0.0 }
  0x8c   : > { %v288_v10 = vpack.c.bf16 %v285_v9, %v285_v9 }
  0x8e   : > { %v300_v11 = vsel %vm298_vm0, %v288_v10, 0 }
  0x8f   : > { %309 = vmatpush.bf16.msra.mxu0 %v300_v11 }
  0x92   : > { %487 = vmatmul.msk.bf16.vlgmr.msra.gmra.mxu0 %vm294_vm1, %v490_v12 }
 0x10f   : > { %v311_v13 = vpop.f32.mrf.mxu0 }
 0x110   : > { %v317_v15 = vrot.slane %v311_v13, 4 }
 0x117   : > { %v313_v14 = vpop.f32.mrf.mxu0 }
 0x118   : > { %325 = vrot.lane.b32.xlu1 %v313_v14, %s512_s9 }
 0x120   : > { %318 = vrot.lane.b32.xlu1 %v317_v15, %s513_s10 }
 0x18a   : > { %v326_v16 = vpop.permute.xlu1 %325 }
 0x18b   : > { %v329_v17 = vsel %vm328_vm2, %v326_v16, 0.0 }
 0x18c   : > { %v331_v18 = vrot.slane %v329_v17, 4 }
 0x18e   : > { %v333_v19 = vadd.f32 %v331_v18, %v313_v14 }
 0x190   : > { %v337_v20 = vpack.c.bf16 %v333_v19, %v333_v19  ;;  %v351_v21 = vmul.f32 %v333_v19, %v333_v19  ;;  %v343_v30 = vsel %vm339_vm5, %v333_v19, 0.0 }
 0x192   : > { %338 = vst.msk [vmem:[%s263_s14] sm:$0x3] %vm335_vm3, %v337_v20  ;;  %v319_v22 = vpop.permute.xlu1 %318  ;;  %v352_v23 = vsel %vm339_vm5, %v351_v21, 0.0 }
 0x193   : > { %v322_v24 = vsel %vm321_vm4, 0.0, %v319_v22  ;;  %353 = vadd.xlane.f32.xlu1 %v352_v23 }
 0x194   : > { %v323_v25 = vadd.f32 %v322_v24, %v311_v13 }
 0x196   : > { %v334_v26 = vpack.c.bf16 %v323_v25, %v323_v25  ;;  %v340_v27 = vsel %vm339_vm5, %v323_v25, 0.0  ;;  %v347_v28 = vmul.f32 %v323_v25, %v323_v25 }
 0x197   : > { %341 = vadd.xlane.f32.xlu2 %v340_v27 }
 0x198   : > { %336 = vst.msk [vmem:[%s259_s17] sm:$0x3] %vm335_vm3, %v334_v26  ;;  %v348_v29 = vsel %vm339_vm5, %v347_v28, 0.0 }
 0x199   : > { %349 = vadd.xlane.f32.xlu0 %v348_v29 }
 0x19f   : > { %344 = vadd.xlane.f32.xlu2 %v343_v30 }
 0x206   : > { %v354_v33 = vpop.xlane.xlu1 %353 }
 0x20a   : > { %v342_v31 = vpop.xlane.xlu2 %341 }
 0x20c   : > { %v350_v32 = vpop.xlane.xlu0 %349 }
 0x20d   : > { %v355_v35 = vadd.f32 %v354_v33, %v350_v32 }
 0x212   : > { %v345_v34 = vpop.xlane.xlu2 %344 }
 0x213   : > { %v346_v36 = vadd.f32 %v345_v34, %v342_v31 }
 0x215   : > { %v356_v37 = vsel %vm321_vm4, %v346_v36, %v355_v35 }
 0x216   : > { %358 = vst.msk [vmem:[%s267_s20] sm:$0xf] %vm357_vm6, %v356_v37 }
 0x217 PF: > { %s17_s21 = sadd.s32 1, %s509_s21  }
 0x218   : > { %p14_p4 = scmp.ge.s32.totalorder %s17_s21, 4  }
 0x21a   :  { %16 = sbr.rel (!%p14_p4) target bundleno = 1 (0x1), region = 90 }

// kernel: expand_residual_forward.2
= control target key start
LH: loop header
LB: loop body
LE: loop exit
PB: predicated region body
PF: predicated region fallthrough
CT: control target
= control target key end

     0   :  { %s366_s12 = smov 0   ;;  %s395_s0 = inlined_call_operand.vmem [shape: f32[2,4,16], index: 0, kind: input, shape index: {}]   ;;  %s396_s1 = inlined_call_operand.vmem [shape: bf16[8,12], index: 1, kind: input, shape index: {}]   ;;  %s397_s2 = inlined_call_operand.vmem [shape: bf16[2,8,16], index: 2, kind: output, shape index: {0}]   ;;  %s398_s3 = inlined_call_operand.vmem [shape: f32[2,8,2], index: 3, kind: output, shape index: {1}]  }
   0x1 LB: > { %s315_s13 = sadd.s32 4294967295, %s342_s12   ;;  %p319_p0 = scmp.ge.s32.totalorder %s342_s12, 1  ;;  %s342_s12 = sphi %s366_s12, %s14_s12  }
   0x2   : > { %p139_p1 = scmp.lt.s32.totalorder %s342_s12, 3 }
   0x4   : > { %p140_p2 = pnand %p319_p0, %p139_p1 }
   0x5   : > { %p165_p3 = scmp.lt.s32.totalorder (!%p140_p2), %s315_s13, 1  ;;  %s344_s18 = smov (!%p140_p2), 1  }
   0x6   : > { %143 = sbr.rel (%p140_p2) target bundleno = 398 (0x18e), region = 28  ;;  %s345_s19 = smov (!%p140_p2), 127  }
   0xb   : > { %s400_s13 = smov (!%p165_p3, %s315_s13), 1  ;;  %vm183_vm0 = vcmask 7168   ;;  %vm188_vm1 = vcmask 121856   ;;  %vm192_vm2 = vcmask 1043456   ;;  %vm200_vm3 = vcmask 1045504  }
   0xc   : > { %s320_s14 = sshll.u32 %s400_s13, 2  ;;  %v194_v9 = vld [vmem:[%s396_s1] sm:$0xf]  ;;  %vm196_vm4 = vcmask 97280   ;;  %vm220_vm5 = vcmask 130048   ;;  %vm218_vm6 = vcmask 125952  }
   0xd   : > { %s168_s17 = scalar_lea.vmem %s395_s0, %s320_s14  ;;  %s172_s24 = scalar_lea.vmem %s397_s2, %s320_s14  ;;  %vm229_vm7 = vcmask 15360  }
   0xe   : > { %v178_v0 = vld [vmem:[%s168_s17] sm:$0xf]  ;;  %s322_s25 = sshll.u32 %s400_s13, 3 }
   0xf   : > { %180 = vrot.lane.b32.xlu0 %v178_v0, %s344_s18  ;;  %v190_v2 = vrot.slane %v178_v0, 4  ;;  %s176_s28 = scalar_lea.vmem %s398_s3, %s322_s25 }
  0x17   : > { %185 = vrot.lane.b32.xlu0 %v178_v0, %s345_s19 }
  0x81   : > { %v181_v1 = vpop.permute.xlu0 %180 }
  0x82   : > { %v184_v3 = vsel %vm183_vm0, 0.0, %v181_v1 }
  0x83   : > { %v193_v6 = vsel %vm192_vm2, %v184_v3, %v190_v2 }
  0x89   : > { %v186_v4 = vpop.permute.xlu0 %185 }
  0x8a   : > { %v189_v5 = vsel %vm188_vm1, %v186_v4, 0.0 }
  0x8b   : > { %v195_v7 = vpack.c.bf16 %v189_v5, %v193_v6 }
  0x8d   : > { %v202_v8 = vsel %vm200_vm3, %v195_v7, 0 }
  0x8e   : > { %211 = vmatpush.bf16.msra.mxu0 %v202_v8 }
  0x91   : > { %323 = vmatmul.msk.bf16.vlgmr.msra.gmra.mxu0 %vm196_vm4, %v194_v9 }
 0x10e   : > { %v213_v10 = vpop.f32.mrf.mxu0 }
 0x10f   : > { %v217_v11 = vpack.c.bf16 %v213_v10, %v213_v10  ;;  %v221_v12 = vsel %vm220_vm5, %v213_v10, 0.0  ;;  %v224_v13 = vmul.f32 %v213_v10, %v213_v10 }
 0x110   : > { %222 = vadd.xlane.f32.xlu1 %v221_v12 }
 0x111   : > { %219 = vst.msk [vmem:[%s172_s24] sm:$0xf] %vm218_vm6, %v217_v11  ;;  %v225_v15 = vsel %vm220_vm5, %v224_v13, 0.0 }
 0x116   : > { %v215_v14 = vpop.f32.mrf.mxu0 }
 0x118   : > { %226 = vadd.xlane.f32.xlu1 %v225_v15 }
 0x183   : > { %v223_v16 = vpop.xlane.xlu1 %222 }
 0x18b   : > { %v227_v17 = vpop.xlane.xlu1 %226 }
 0x18c   : > { %v228_v18 = vsel %vm183_vm0, %v223_v16, %v227_v17 }
 0x18d   : > { %230 = vst.msk [vmem:[%s176_s28] sm:$0xff] %vm229_vm7, %v228_v18 }
 0x18e PF: > { %s14_s12 = sadd.s32 1, %s342_s12  }
 0x18f   : > { %p11_p4 = scmp.ge.s32.totalorder %s14_s12, 4  }
 0x191   :  { %13 = sbr.rel (!%p11_p4) target bundleno = 1 (0x1), region = 70 }

</bundles_post_ra>
